<compile_context>
chip_gen: v6e
topology: v6e:2x2x1
jax: 0.10.0
libtpu: 0.0.40
codegen_flags: <defaults>
</compile_context>

<pallas_src>
import jax
import jax.numpy as jnp
from jax.experimental import pallas as pl
from jax.experimental.pallas import tpu as pltpu


def _fused_decoder_kernel(x_ref, w1_ref, b1_ref, w2_ref, b2_ref, o_ref):
    # x_ref : (Cin1, tile_hw)   pixels of one image in the lane dim
    # w1_ref: (P1, Cin1)        b1_ref: (P1, 1)
    # w2_ref: (P2, P1)          b2_ref: (P2, 1)
    # o_ref : (P2, tile_hw)     lane-dense output
    h = jnp.dot(w1_ref[...], x_ref[...], preferred_element_type=jnp.float32)
    h = jnp.maximum(h + b1_ref[...], 0.0)                     # layer-1 bias + ReLU
    y = jnp.dot(w2_ref[...], h, preferred_element_type=jnp.float32)
    y = jnp.maximum(y + b2_ref[...], 0.0)                     # layer-2 bias + ReLU
    o_ref[...] = y.astype(o_ref.dtype)


def _pack_params(params, k):
    """Build the transposed / block-embedded weight matrices (tiny, one-time)."""
    (w1, b1), (w2, b2) = params
    cin1, cout1 = w1.shape[0], w1.shape[1]
    cin2, cout2 = w2.shape[0], w2.shape[1]
    kk = k * k
    p1 = cout1 * kk
    p2 = kk * cout2 * kk

    w1t = jnp.transpose(w1.reshape(cin1, p1))                              # (P1, Cin1)
    b1c = jnp.broadcast_to(b1[:, None], (cout1, kk)).reshape(p1, 1)        # (P1, 1)

    # W2big[(c*kk + j1), (j1*Cout2*kk + o*kk + j2)] = w2[c, o, j2]  (0 elsewhere)
    w2f = w2.reshape(cin2, cout2 * kk)                                     # (Cin2, Cout2*kk)
    eye = jnp.eye(kk, dtype=w2.dtype)
    w2big = jnp.einsum('cp,ij->cijp', w2f, eye).reshape(cin2 * kk, p2)     # (P1, P2)
    w2t = jnp.transpose(w2big)                                             # (P2, P1)
    b2c = jnp.broadcast_to(b2[None, :, None], (kk, cout2, kk)).reshape(p2, 1)
    return w1t, b1c, w2t, b2c


def _vmem_limit_bytes():
    """Per-generation scoped-VMEM limit: 3/4 of reported capacity, <= 100 MiB.

    v5e/v6e report 128 MiB physical (default scoped is only 16/32 MiB, so we
    raise it); v7x reports 64 MiB per TensorCore, so the limit -- and therefore
    the lane tile picked below -- automatically shrinks there.
    """
    cap = 64 << 20  # conservative fallback (v7x per-TC VMEM)
    try:
        info = pltpu.get_tpu_info()
        cap = int(getattr(info, "vmem_capacity_bytes", cap) or cap)
    except Exception:
        pass
    return min((cap * 3) // 4, 100 << 20)


def _select_tile_hw(HW, N, per_lane_bytes, fixed_bytes, vmem_limit, max_tile_hw):
    """Pick a legal lane-tile: either the full HW (one block) or a multiple of 128."""
    budget = max(vmem_limit - fixed_bytes - (2 << 20), 128 * per_lane_bytes)
    cap = min(max_tile_hw, budget // max(per_lane_bytes, 1))
    cap = max(128, (cap // 128) * 128)
    tile = HW if HW <= cap else cap       # full-dim block or 128-aligned big tile

    # v7x megacore: aim for >= 4 grid steps so both TensorCores get work.
    # Floor at 128 lanes so stores stay lane-dense; harmless on v5e/v6e.
    while N * ((HW + tile - 1) // tile) < 4 and tile > 128:
        nxt = max(128, ((tile // 2) // 128) * 128)
        if nxt >= tile:
            break
        tile = nxt
    return tile


def decoder_forward(x, params, k, max_tile_hw=32768):
    """Fused Decoder forward: relu(convT2) o relu(convT1), both stride == k.

    x: (N, 2*num_kernels, H, W) NCHW -> (N, 1, H*k*k, W*k*k)
    """
    (w1, _), (w2, _) = params
    N, cin1, H, W = x.shape
    cout1 = w1.shape[1]
    cout2 = w2.shape[1]
    kk = k * k
    HW = H * W
    p1 = cout1 * kk
    p2 = kk * cout2 * kk

    w1t, b1c, w2t, b2c = _pack_params(params, k)

    # pixels-in-lanes: collapse H,W (free reshape); N stays a grid axis so no
    # wrapper transpose of the activations is needed.
    x3 = x.reshape(N, cin1, HW)

    # Lane-tile selection against the per-generation VMEM budget. No padding:
    # the ragged last lane tile is handled by Pallas (masked output store;
    # garbage tail input lanes are lane-independent so they cannot contaminate
    # valid output columns -- both GEMMs contract only over the full channel dim).
    itemsize = jnp.dtype(x.dtype).itemsize
    per_lane = itemsize * (2 * cin1 + 3 * p2 + p1)   # dbl-buffered x/out + h + y
    fixed = 2 * itemsize * (p1 * cin1 + p1 + p2 * p1 + p2)  # dbl-buffered weights/biases
    vmem_limit = _vmem_limit_bytes()
    tile_hw = _select_tile_hw(HW, N, per_lane, fixed, vmem_limit, max_tile_hw)

    grid = (N, pl.cdiv(HW, tile_hw))

    # "Executed" flops (GEMM 2 includes the kk-x structured-zero inflation).
    flops = 2 * N * HW * (cin1 * p1 + p1 * p2)
    bytes_accessed = itemsize * (
        x3.size + w1t.size + b1c.size + w2t.size + b2c.size + N * p2 * HW)

    yt = pl.pallas_call(
        _fused_decoder_kernel,
        out_shape=jax.ShapeDtypeStruct((N, p2, HW), x.dtype),
        grid_spec=pltpu.PrefetchScalarGridSpec(
            num_scalar_prefetch=0,
            grid=grid,
            in_specs=[
                # activations: one image's pixel tile, lane-dense
                pl.BlockSpec((None, cin1, tile_hw), lambda n, i: (n, 0, i)),
                # constant-index weights / biases (tiny; default buffering ok)
                pl.BlockSpec((p1, cin1), lambda n, i: (0, 0)),
                pl.BlockSpec((p1, 1), lambda n, i: (0, 0)),
                pl.BlockSpec((p2, p1), lambda n, i: (0, 0)),
                pl.BlockSpec((p2, 1), lambda n, i: (0, 0)),
            ],
            out_specs=pl.BlockSpec((None, p2, tile_hw), lambda n, i: (n, 0, i)),
        ),
        compiler_params=pltpu.CompilerParams(
            dimension_semantics=("parallel", "parallel"),
            vmem_limit_bytes=vmem_limit),
        cost_estimate=pl.CostEstimate(
            flops=flops, transcendentals=0, bytes_accessed=bytes_accessed),
    )(x3, w1t, b1c, w2t, b2c)

    # Final scatter of each pixel's (k^2, k^2) output block into NCHW.
    # Pure layout glue (inherent interleave of the two nested k-expansions);
    # not expressible as a rectangular output BlockSpec in this lane layout.
    # TODO(synk): for W*kk >= ~512 fold this interleave into the kernel (see header).
    y = yt.reshape(N, k, k, cout2, k, k, H, W)        # (n, p1, q1, o, p2, q2, h, w)
    y = jnp.transpose(y, (0, 3, 6, 1, 4, 7, 2, 5))    # (n, o, h, p1, p2, w, q1, q2)
    return y.reshape(N, cout2, H * kk, W * kk)


# ---------------------------------------------------------------------------
# Independent pure-JAX reference (matches PyTorch ConvTranspose2d semantics)
# ---------------------------------------------------------------------------
def _reference_layer(x, weight, bias, k):
    N, Cin, H, W = x.shape
    Cout = weight.shape[1]
    y = jnp.einsum('nchw,copq->nohwpq', x, weight)
    y = y + bias[None, :, None, None, None, None]
    y = jnp.transpose(y, (0, 1, 2, 4, 3, 5)).reshape(N, Cout, H * k, W * k)
    return jnp.maximum(y, 0.0)


def _reference_decoder(x, params, k):
    (w1, b1), (w2, b2) = params
    return _reference_layer(_reference_layer(x, w1, b1, k), w2, b2, k)


def init_decoder_params(key, kernel_size, num_kernels, dtype=jnp.float32):
    # ConvTranspose2d weight shape: (in_channels, out_channels, kH, kW)
    k1, k2, k3, k4 = jax.random.split(key, 4)
    cin1 = 2 * num_kernels
    w1 = 0.1 * jax.random.normal(k1, (cin1, num_kernels, kernel_size, kernel_size), dtype)
    b1 = 0.1 * jax.random.normal(k2, (num_kernels,), dtype)
    w2 = 0.1 * jax.random.normal(k3, (num_kernels, 1, kernel_size, kernel_size), dtype)
    b2 = 0.1 * jax.random.normal(k4, (1,), dtype)
    return ((w1, b1), (w2, b2))


if __name__ == "__main__":
    kernel_size = 2
    num_kernels = 4

    key = jax.random.PRNGKey(0)
    kx, kx2, kp = jax.random.split(key, 3)
    params = init_decoder_params(kp, kernel_size, num_kernels)

    # Case 1: small spatial -> single full-HW lane block per image, grid = (N, 1).
    x = jax.random.normal(kx, (2, 2 * num_kernels, 4, 4), jnp.float32)
    fwd = jax.jit(lambda a: decoder_forward(a, params, kernel_size))
    out = jax.block_until_ready(fwd(x))
    ref = _reference_decoder(x, params, kernel_size)
    assert out.shape == (2, 1, 4 * kernel_size ** 2, 4 * kernel_size ** 2), out.shape
    assert jnp.allclose(out, ref, atol=1e-5, rtol=1e-5), float(jnp.max(jnp.abs(out - ref)))

    # Case 2: HW = 204 with a 128-lane tile -> exercises the unpadded ragged
    # last lane tile (masked store) and the >=2-step grid (megacore split).
    x2 = jax.random.normal(kx2, (1, 2 * num_kernels, 12, 17), jnp.float32)
    out2 = jax.block_until_ready(decoder_forward(x2, params, kernel_size))
    ref2 = _reference_decoder(x2, params, kernel_size)
    assert out2.shape == (1, 1, 12 * kernel_size ** 2, 17 * kernel_size ** 2), out2.shape
    assert jnp.allclose(out2, ref2, atol=1e-5, rtol=1e-5), float(jnp.max(jnp.abs(out2 - ref2)))

    print("KERNEL_OK")
</pallas_src>

<mosaic_0001>
module attributes {stable_mosaic.version = 11 : i64} {
  func.func @_fused_decoder_kernel(%arg0: i32, %arg1: i32, %arg2: memref<1x8x16xf32, #tpu.memory_space<vmem>>, %arg3: memref<16x8xf32, #tpu.memory_space<vmem>>, %arg4: memref<16x1xf32, #tpu.memory_space<vmem>>, %arg5: memref<16x16xf32, #tpu.memory_space<vmem>>, %arg6: memref<16x1xf32, #tpu.memory_space<vmem>>, %arg7: memref<1x16x16xf32, #tpu.memory_space<vmem>>) attributes {dimension_semantics = [#tpu.dimension_semantics<parallel>, #tpu.dimension_semantics<parallel>], iteration_bounds = array<i64: 2, 1>, scalar_prefetch = 0 : i64, scratch_operands = 0 : i64, tpu.core_type = #tpu.core_type<tc>, window_params = [{transform_indices = @transform_0, window_bounds = array<i64: 1, 8, 16>}, {pipeline_mode = #tpu.pipeline_mode<synchronous>, transform_indices = @transform_1, window_bounds = array<i64: 16, 8>}, {pipeline_mode = #tpu.pipeline_mode<synchronous>, transform_indices = @transform_2, window_bounds = array<i64: 16, 1>}, {pipeline_mode = #tpu.pipeline_mode<synchronous>, transform_indices = @transform_3, window_bounds = array<i64: 16, 16>}, {pipeline_mode = #tpu.pipeline_mode<synchronous>, transform_indices = @transform_4, window_bounds = array<i64: 16, 1>}, {transform_indices = @transform_5, window_bounds = array<i64: 1, 16, 16>}]} {
    %c0 = arith.constant 0 : index
    %c0_0 = arith.constant 0 : index
    %0 = vector.load %arg3[%c0, %c0_0] : memref<16x8xf32, #tpu.memory_space<vmem>>, vector<16x8xf32>
    %c0_1 = arith.constant 0 : index
    %c0_2 = arith.constant 0 : index
    %c0_3 = arith.constant 0 : index
    %1 = vector.load %arg2[%c0_1, %c0_2, %c0_3] : memref<1x8x16xf32, #tpu.memory_space<vmem>>, vector<1x8x16xf32>
    %2 = vector.shape_cast %1 : vector<1x8x16xf32> to vector<8x16xf32>
    %cst = arith.constant dense<0.000000e+00> : vector<16x16xf32>
    %3 = tpu.matmul %0, %2, %cst {dimension_numbers = #tpu.dot_dimension_numbers<[1], [0], [0], [1], [0, 0, 1, 1], [], []>} : vector<16x8xf32>, vector<8x16xf32>, vector<16x16xf32> -> vector<16x16xf32>
    %c0_4 = arith.constant 0 : index
    %c0_5 = arith.constant 0 : index
    %4 = vector.load %arg4[%c0_4, %c0_5] : memref<16x1xf32, #tpu.memory_space<vmem>>, vector<16x1xf32>
    %5 = vector.broadcast %4 : vector<16x1xf32> to vector<16x16xf32>
    %6 = arith.addf %3, %5 : vector<16x16xf32>
    %cst_6 = arith.constant 0.000000e+00 : f32
    %7 = vector.broadcast %cst_6 : f32 to vector<16x16xf32>
    %8 = arith.maximumf %6, %7 : vector<16x16xf32>
    %c0_7 = arith.constant 0 : index
    %c0_8 = arith.constant 0 : index
    %9 = vector.load %arg5[%c0_7, %c0_8] : memref<16x16xf32, #tpu.memory_space<vmem>>, vector<16x16xf32>
    %cst_9 = arith.constant dense<0.000000e+00> : vector<16x16xf32>
    %10 = tpu.matmul %9, %8, %cst_9 {dimension_numbers = #tpu.dot_dimension_numbers<[1], [0], [0], [1], [0, 0, 1, 1], [], []>} : vector<16x16xf32>, vector<16x16xf32>, vector<16x16xf32> -> vector<16x16xf32>
    %c0_10 = arith.constant 0 : index
    %c0_11 = arith.constant 0 : index
    %11 = vector.load %arg6[%c0_10, %c0_11] : memref<16x1xf32, #tpu.memory_space<vmem>>, vector<16x1xf32>
    %12 = vector.broadcast %11 : vector<16x1xf32> to vector<16x16xf32>
    %13 = arith.addf %10, %12 : vector<16x16xf32>
    %cst_12 = arith.constant 0.000000e+00 : f32
    %14 = vector.broadcast %cst_12 : f32 to vector<16x16xf32>
    %15 = arith.maximumf %13, %14 : vector<16x16xf32>
    %c0_13 = arith.constant 0 : index
    %c0_14 = arith.constant 0 : index
    %c0_15 = arith.constant 0 : index
    %16 = vector.load %arg7[%c0_13, %c0_14, %c0_15] : memref<1x16x16xf32, #tpu.memory_space<vmem>>, vector<1x16x16xf32>
    %17 = vector.shape_cast %16 : vector<1x16x16xf32> to vector<16x16xf32>
    %18 = vector.shape_cast %15 : vector<16x16xf32> to vector<1x16x16xf32>
    tpu.vector_store %arg7[%c0_13, %c0_14, %c0_15], %18 {strides = array<i32>} : memref<1x16x16xf32, #tpu.memory_space<vmem>>, vector<1x16x16xf32>,
    return
  }
  func.func @transform_0(%arg0: i32, %arg1: i32) -> (i32, i32, i32) {
    %c0_i32 = arith.constant 0 : i32
    %c0_i32_0 = arith.constant 0 : i32
    return %arg0, %c0_i32, %arg1 : i32, i32, i32
  }
  func.func @transform_1(%arg0: i32, %arg1: i32) -> (i32, i32) {
    %c0_i32 = arith.constant 0 : i32
    %c0_i32_0 = arith.constant 0 : i32
    %c0_i32_1 = arith.constant 0 : i32
    return %c0_i32, %c0_i32_0 : i32, i32
  }
  func.func @transform_2(%arg0: i32, %arg1: i32) -> (i32, i32) {
    %c0_i32 = arith.constant 0 : i32
    %c0_i32_0 = arith.constant 0 : i32
    %c0_i32_1 = arith.constant 0 : i32
    return %c0_i32, %c0_i32_0 : i32, i32
  }
  func.func @transform_3(%arg0: i32, %arg1: i32) -> (i32, i32) {
    %c0_i32 = arith.constant 0 : i32
    %c0_i32_0 = arith.constant 0 : i32
    %c0_i32_1 = arith.constant 0 : i32
    return %c0_i32, %c0_i32_0 : i32, i32
  }
  func.func @transform_4(%arg0: i32, %arg1: i32) -> (i32, i32) {
    %c0_i32 = arith.constant 0 : i32
    %c0_i32_0 = arith.constant 0 : i32
    %c0_i32_1 = arith.constant 0 : i32
    return %c0_i32, %c0_i32_0 : i32, i32
  }
  func.func @transform_5(%arg0: i32, %arg1: i32) -> (i32, i32, i32) {
    %c0_i32 = arith.constant 0 : i32
    %c0_i32_0 = arith.constant 0 : i32
    return %arg0, %c0_i32, %arg1 : i32, i32, i32
  }
}

</mosaic_0001>

<bundles_post_ra>
// kernel: _lambda_.1
= control target key start
LH: loop header
LB: loop body
LE: loop exit
PB: predicated region body
PF: predicated region fallthrough
CT: control target
= control target key end

     0   :  { %s648_s18 = smov 0   ;;  %s650_s19 = smov 0   ;;  %s715_s0 = inlined_call_operand.vmem [shape: f32[2,8,16], index: 0, kind: input, shape index: {}]   ;;  %s716_s1 = inlined_call_operand.vmem [shape: f32[16,8], index: 1, kind: input, shape index: {}]   ;;  %s717_s2 = inlined_call_operand.vmem [shape: f32[16,1], index: 2, kind: input, shape index: {}]   ;;  %s718_s3 = inlined_call_operand.vmem [shape: f32[16,16], index: 3, kind: input, shape index: {}]   ;;  %s719_s4 = inlined_call_operand.vmem [shape: f32[16,1], index: 4, kind: input, shape index: {}]   ;;  %s720_s5 = inlined_call_operand.vmem [shape: f32[2,16,16], index: 5, kind: output, shape index: {}]  }
   0x1   :  { %s652_s20 = smov 0  }
   0x2 LB: > { %s27_s21 = sadd.s32 1, %s611_s19  ;;  %p536_p0 = scmp.ge.s32.totalorder %s615_s20, 1  ;;  %s615_s20 = sphi %s652_s20, %s15_s20   ;;  %s611_s19 = sphi %s650_s19, %s722_s19   ;;  %s607_s18 = sphi %s648_s18, %s721_s18  }
   0x3   : > { %p29_p1 = scmp.ge.s32.totalorder %s27_s21, 2  ;;  %p205_p2 = scmp.lt.s32.totalorder %s615_s20, 3 }
   0x5   : > { %s724_s21 = smov (%p29_p1, %s27_s21), 0  ;;  %p206_p3 = pnand %p536_p0, %p205_p2 }
   0x6   : > { %p238_p4 = scmp.lt.s32.totalorder (!%p206_p3), %s607_s18, 1 }
   0x7   : > { %209 = sbr.rel (%p206_p3) target bundleno = 419 (0x1a3), region = 40 }
   0xc   : > { %v253_v0 = vld [vmem:[%s716_s1] sm:$0xff]  ;;  %vm268_vm0 = vcmask 64512   ;;  %v257_v1 = vld [vmem:[%s717_s2 + $0x8] sm:$0xff]  ;;  %v617_v2 = vmov 0   ;;  %s726_s18 = smov (!%p238_p4, %s607_s18), 1  ;;  %vm366_vm1 = vcmask 130048  }
   0xd   : > { %556 = vmatprep.mubr.msk.f32.mxu0 %vm268_vm0, %v253_v0  ;;  %591 = vset.pattern.permute.xlu0 %v617_v2  ;;  %v256_v3 = vld [vmem:[%s717_s2] sm:$0xff]  ;;  %s537_s28 = sshll.u32 %s726_s18, 3  ;;  %v254_v5 = vld [vmem:[%s716_s1 + $0x8] sm:$0xff]  ;;  %s546_s17 = sshll.u32 %s726_s18, 4 }
   0xe   : > { %265 = vperm.xlu0 %591, %v257_v1   ;;  %592 = vset.pattern.permute.xlu1 %v617_v2  ;;  %s244_s6 = scalar_lea.vmem %s715_s0, %s537_s28  ;;  %v352_v6 = vld [vmem:[%s718_s3] sm:$0xff]  ;;  %v355_v8 = vld [vmem:[%s719_s4 + $0x8] sm:$0xff]  ;;  %s252_s24 = scalar_lea.vmem %s720_s5, %s546_s17 }
   0xf   : > { %v255_v4 = vld [vmem:[%s244_s6] sm:$0xff]  ;;  %563 = vmatprep.mubr.msk.f32.mxu1 %vm366_vm1, %v352_v6  ;;  %v353_v17 = vld [vmem:[%s718_s3 + $0x8] sm:$0xff] }
  0x10   : > { %554 = vmatprep.subr.mxu0 %v255_v4  ;;  %v354_v7 = vld [vmem:[%s719_s4] sm:$0xff] }
  0x11   : > { %555 = vmatpush3.msra.mxu0 %v255_v4  ;;  %358 = vperm.xlu1 %592, %v354_v7  }
  0x12   : > { %260 = vperm.xlu0 %591, %v256_v3   ;;  %557 = vmatmul.mubr.msk.f32.vlgmr.msra.gmra.mxu0 %vm268_vm0, %v254_v5 }
  0x15   : > { %363 = vperm.xlu1 %592, %v355_v8  }
  0x89   : > { %v266_v9 = vpop.permute.xlu0 %265 }
  0x8c   : > { %v359_v18 = vpop.permute.xlu1 %358 }
  0x8d   : > { %v261_v12 = vpop.permute.xlu0 %260 }
  0x90   : > { %v364_v19 = vpop.permute.xlu1 %363 }
  0xd2   : > { %v558_v10 = vpop.f32.mrf.mxu0 }
  0xd3   : > { %v347_v11 = vadd.f32 %v558_v10, %v266_v9 }
  0xd4   : > { %v341_v13 = vpop.f32.mrf.mxu0 }
  0xd5   : > { %v351_v14 = vmax.f32 %v347_v11, 0.0  ;;  %v342_v15 = vadd.f32 %v341_v13, %v261_v12 }
  0xd7   : > { %v350_v16 = vmax.f32 %v342_v15, 0.0  ;;  %559 = vmatprep.subr.mxu1 %v351_v14 }
  0xd8   : > { %560 = vmatpush3.msra.mxu1 %v351_v14 }
  0xd9   : > { %561 = vmatprep.subr.mxu1 %v350_v16 }
  0xda   : > { %562 = vmatpush3.msra.mxu1 %v350_v16 }
  0xdb   : > { %564 = vmatmul.mubr.msk.f32.vlgmr.msra.gmra.mxu1 %vm366_vm1, %v353_v17 }
 0x19b   : > { %v565_v20 = vpop.f32.mrf.mxu1 }
 0x19c   : > { %v445_v21 = vadd.f32 %v565_v20, %v364_v19 }
 0x19d   : > { %v439_v22 = vpop.f32.mrf.mxu1 }
 0x19e   : > { %v449_v23 = vmax.f32 %v445_v21, 0.0  ;;  %v440_v24 = vadd.f32 %v439_v22, %v359_v18 }
 0x1a0   : > { %451 = vst.msk [vmem:[%s252_s24 + $0x8] sm:$0xff] %vm366_vm1, %v449_v23  ;;  %v448_v25 = vmax.f32 %v440_v24, 0.0 }
 0x1a2   : > { %450 = vst.msk [vmem:[%s252_s24] sm:$0xff] %vm366_vm1, %v448_v25 }
 0x1a3 PF: > { %s15_s20 = sadd.s32 1, %s615_s20   ;;  %s721_s18 = smov %s611_s19 }
 0x1a4   : > { %p12_p5 = scmp.ge.s32.totalorder %s15_s20, 4   ;;  %s722_s19 = smov %s724_s21 }
 0x1a6   :  { %14 = sbr.rel (!%p12_p5) target bundleno = 2 (0x2), region = 70 }

</bundles_post_ra>
